<compile_context>
chip_gen: v5e
topology: v5e:2x2
jax: 0.10.0
libtpu: 0.0.40
codegen_flags: <defaults>
</compile_context>

<pallas_src>
import functools

import jax
import jax.numpy as jnp
from jax.experimental import pallas as pl
from jax.experimental.pallas import tpu as pltpu


# --------------------------------------------------------------------------- #
# Graph / padding helpers (plain JAX glue)
# --------------------------------------------------------------------------- #
def _build_norm_adj(edge_index, num_nodes):
    """Dense GCN-normalized adjacency with self-loops (PyG GCNConv gcn_norm)."""
    src = edge_index[0]
    dst = edge_index[1]
    a = jnp.zeros((num_nodes, num_nodes), jnp.float32)
    # message j -> i  means  A_hat[i, j] != 0
    a = a.at[dst, src].add(1.0)
    a = a + jnp.eye(num_nodes, dtype=jnp.float32)            # add self-loops
    deg = jnp.sum(a, axis=1)                                  # in-degree (incl. self-loop)
    d_inv_sqrt = jnp.where(deg > 0, 1.0 / jnp.sqrt(deg), 0.0)
    return d_inv_sqrt[:, None] * a * d_inv_sqrt[None, :]


def _round_up(x, m):
    return ((x + m - 1) // m) * m


def _pad2(x, rows, cols):
    r, c = x.shape
    return jnp.pad(x, ((0, rows - r), (0, cols - c)))


def _pick_tile(n_p):
    # Modest tiles keep per-step VMEM well under the 32 MiB scoped default on
    # every generation (v7x has only 64 MiB physical VMEM); on v6e/v5e larger
    # tiles (256/512) kick in automatically once N is big enough.
    for cand in (512, 256, 128):
        if n_p % cand == 0:
            return cand
    return n_p


# --------------------------------------------------------------------------- #
# One GCN layer:  out = epilogue( A_hat @ (X @ W) + b )
# --------------------------------------------------------------------------- #
def _gcn_layer_kernel(a_ref, x_ref, w_ref, b_ref, out_ref, acc_ref, *,
                      apply_relu, log_softmax_classes):
    k = pl.program_id(1)

    @pl.when(k == 0)
    def _init():
        acc_ref[...] = jnp.zeros_like(acc_ref)

    # (tk, Fin)@(Fin, Fout) then (tm, tk)@(tk, Fout): bf16 on the MXU, f32 acc.
    xw = jnp.dot(x_ref[...], w_ref[...], preferred_element_type=jnp.float32)
    acc_ref[...] += jnp.dot(a_ref[...], xw.astype(jnp.bfloat16),
                            preferred_element_type=jnp.float32)

    @pl.when(k == pl.num_programs(1) - 1)
    def _finalize():
        z = acc_ref[...] + b_ref[...]
        if apply_relu:
            z = jnp.maximum(z, 0.0)
        if log_softmax_classes is not None:
            # Mask padded class columns so they do not contribute to the sum.
            col = jax.lax.broadcasted_iota(jnp.int32, z.shape, 1)
            z = jnp.where(col < log_softmax_classes, z, -1e30)
            m = jnp.max(z, axis=1, keepdims=True)
            lse = jnp.log(jnp.sum(jnp.exp(z - m), axis=1, keepdims=True)) + m
            z = z - lse
        out_ref[...] = z.astype(out_ref.dtype)


def _gcn_layer(a_bf16, x_bf16, w_bf16, b_f32, *, tm, tk, apply_relu,
               log_softmax_classes, out_dtype):
    n_p = a_bf16.shape[0]
    f_in = x_bf16.shape[1]
    f_out = w_bf16.shape[1]
    grid = (n_p // tm, n_p // tk)

    kernel = functools.partial(
        _gcn_layer_kernel,
        apply_relu=apply_relu,
        log_softmax_classes=log_softmax_classes,
    )

    flops = 2 * n_p * f_in * f_out * grid[0] + 2 * n_p * n_p * f_out
    transcendentals = n_p * f_out if log_softmax_classes is not None else 0
    bytes_accessed = (
        a_bf16.size * 2                       # dominant: one full A_hat pass
        + x_bf16.size * 2 * grid[0]           # X rows re-streamed per row block
        + w_bf16.size * 2 + b_f32.size * 4
        + n_p * f_out * jnp.dtype(out_dtype).itemsize
    )

    return pl.pallas_call(
        kernel,
        out_shape=jax.ShapeDtypeStruct((n_p, f_out), out_dtype),
        grid_spec=pltpu.PrefetchScalarGridSpec(
            num_scalar_prefetch=0,
            grid=grid,
            in_specs=[
                pl.BlockSpec((tm, tk), lambda i, k: (i, k)),        # A_hat tile
                pl.BlockSpec((tk, f_in), lambda i, k: (k, 0)),      # X rows of k-block
                pl.BlockSpec((f_in, f_out), lambda i, k: (0, 0)),   # W (resident)
                pl.BlockSpec((1, f_out), lambda i, k: (0, 0)),      # bias (resident)
            ],
            out_specs=pl.BlockSpec((tm, f_out), lambda i, k: (i, 0)),
            scratch_shapes=[pltpu.VMEM((tm, f_out), jnp.float32)],
        ),
        compiler_params=pltpu.CompilerParams(
            dimension_semantics=("parallel", "arbitrary"),
            # <= 48 MiB is safe on v7x (64 MiB physical) and leaves headroom on
            # v5e/v6e (128 MiB physical, 32 MiB scoped default).
            vmem_limit_bytes=48 * 1024 * 1024,
        ),
        cost_estimate=pl.CostEstimate(
            flops=flops,
            transcendentals=transcendentals,
            bytes_accessed=bytes_accessed,
        ),
    )(a_bf16, x_bf16, w_bf16, b_f32)


# --------------------------------------------------------------------------- #
# Full forward pass
# --------------------------------------------------------------------------- #
def gcn_forward(x, edge_index, w1, b1, w2, b2):
    n, f = x.shape
    h = w1.shape[1]
    c = w2.shape[1]

    n_p = _round_up(n, 128)
    f_p = _round_up(f, 128)
    h_p = _round_up(h, 128)
    c_p = _round_up(c, 128)
    tm = _pick_tile(n_p)
    tk = _pick_tile(n_p)

    a_hat = _build_norm_adj(edge_index, n)

    # Pad + cast matmul operands to bf16 (f32 accumulation inside the kernel).
    a_p = _pad2(a_hat, n_p, n_p).astype(jnp.bfloat16)
    x_p = _pad2(x, n_p, f_p).astype(jnp.bfloat16)
    w1_p = _pad2(w1, f_p, h_p).astype(jnp.bfloat16)
    w2_p = _pad2(w2, h_p, c_p).astype(jnp.bfloat16)
    b1_p = _pad2(b1.reshape(1, h).astype(jnp.float32), 1, h_p)
    b2_p = _pad2(b2.reshape(1, c).astype(jnp.float32), 1, c_p)

    # Layer 1: ReLU(A_hat @ (X @ W1) + b1), kept in bf16 to feed layer 2's MXU.
    h_nodes = _gcn_layer(a_p, x_p, w1_p, b1_p, tm=tm, tk=tk,
                         apply_relu=True, log_softmax_classes=None,
                         out_dtype=jnp.bfloat16)

    # TODO(synk): dropout uses inference semantics (identity); training-mode
    # random mask + 1/(1-p) scaling intentionally omitted.

    # Layer 2: log_softmax(A_hat @ (H @ W2) + b2) over the (unpadded) classes.
    out_p = _gcn_layer(a_p, h_nodes, w2_p, b2_p, tm=tm, tk=tk,
                       apply_relu=False, log_softmax_classes=c,
                       out_dtype=jnp.float32)

    return out_p[:n, :c]


# --------------------------------------------------------------------------- #
# Reference (pure JAX, f32)
# --------------------------------------------------------------------------- #
def _reference(x, edge_index, w1, b1, w2, b2):
    a_hat = _build_norm_adj(edge_index, x.shape[0])
    h = jax.nn.relu(a_hat @ (x @ w1) + b1)
    z = a_hat @ (h @ w2) + b2
    return jax.nn.log_softmax(z, axis=1)


if __name__ == "__main__":
    num_nodes = 16
    num_features = 8
    hidden_channels = 32
    num_classes = 4

    key = jax.random.PRNGKey(0)
    kx, kw1, kb1, kw2, kb2 = jax.random.split(key, 5)

    x = jax.random.normal(kx, (num_nodes, num_features), jnp.float32)

    # deterministic small graph: bidirectional ring over 16 nodes
    src = jnp.arange(num_nodes, dtype=jnp.int32)
    dst = (src + 1) % num_nodes
    edge_index = jnp.stack(
        [jnp.concatenate([src, dst]), jnp.concatenate([dst, src])], axis=0
    )  # [2, 2*N]

    # GCNConv params (glorot-ish deterministic init, zero bias like PyG default)
    w1 = jax.random.normal(kw1, (num_features, hidden_channels), jnp.float32) * (
        1.0 / jnp.sqrt(num_features)
    )
    b1 = jnp.zeros((hidden_channels,), jnp.float32)
    w2 = jax.random.normal(kw2, (hidden_channels, num_classes), jnp.float32) * (
        1.0 / jnp.sqrt(hidden_channels)
    )
    b2 = jnp.zeros((num_classes,), jnp.float32)

    out = gcn_forward(x, edge_index, w1, b1, w2, b2)
    out = jax.block_until_ready(out)

    ref = _reference(x, edge_index, w1, b1, w2, b2)
    assert out.shape == (num_nodes, num_classes)
    # bf16 matmul operands with f32 accumulation: expect ~1e-2-level deviation
    # from the pure-f32 reference.
    assert jnp.allclose(out, ref, atol=5e-2, rtol=5e-2)

    print("KERNEL_OK")
</pallas_src>

<mosaic_0001>
module attributes {stable_mosaic.version = 11 : i64} {
  func.func @_gcn_layer_kernel(%arg0: i32, %arg1: i32, %arg2: memref<128x128xbf16, #tpu.memory_space<vmem>>, %arg3: memref<128x128xbf16, #tpu.memory_space<vmem>>, %arg4: memref<128x128xbf16, #tpu.memory_space<vmem>>, %arg5: memref<1x128xf32, #tpu.memory_space<vmem>>, %arg6: memref<128x128xbf16, #tpu.memory_space<vmem>>, %arg7: memref<128x128xf32, #tpu.memory_space<vmem>>) attributes {dimension_semantics = [#tpu.dimension_semantics<parallel>, #tpu.dimension_semantics<arbitrary>], iteration_bounds = array<i64: 1, 1>, scalar_prefetch = 0 : i64, scratch_operands = 1 : i64, tpu.core_type = #tpu.core_type<tc>, window_params = [{transform_indices = @transform_0, window_bounds = array<i64: 128, 128>}, {transform_indices = @transform_1, window_bounds = array<i64: 128, 128>}, {pipeline_mode = #tpu.pipeline_mode<synchronous>, transform_indices = @transform_2, window_bounds = array<i64: 128, 128>}, {pipeline_mode = #tpu.pipeline_mode<synchronous>, transform_indices = @transform_3, window_bounds = array<i64: 1, 128>}, {transform_indices = @transform_4, window_bounds = array<i64: 128, 128>}]} {
    %c0_i32 = arith.constant 0 : i32
    %0 = arith.cmpi eq, %arg1, %c0_i32 : i32
    %1 = arith.extui %0 : i1 to i32
    %c0_i32_0 = arith.constant 0 : i32
    %2 = arith.cmpi ne, %1, %c0_i32_0 : i32
    scf.if %2 {
      %cst_13 = arith.constant 0.000000e+00 : f32
      %15 = vector.broadcast %cst_13 : f32 to vector<128x128xf32>
      %c0_14 = arith.constant 0 : index
      %c0_15 = arith.constant 0 : index
      %16 = vector.load %arg7[%c0_14, %c0_15] : memref<128x128xf32, #tpu.memory_space<vmem>>, vector<128x128xf32>
      tpu.vector_store %arg7[%c0_14, %c0_15], %15 {strides = array<i32>} : memref<128x128xf32, #tpu.memory_space<vmem>>, vector<128x128xf32>,
    } else {
    }
    %c0 = arith.constant 0 : index
    %c0_1 = arith.constant 0 : index
    %3 = vector.load %arg3[%c0, %c0_1] : memref<128x128xbf16, #tpu.memory_space<vmem>>, vector<128x128xbf16>
    %c0_2 = arith.constant 0 : index
    %c0_3 = arith.constant 0 : index
    %4 = vector.load %arg4[%c0_2, %c0_3] : memref<128x128xbf16, #tpu.memory_space<vmem>>, vector<128x128xbf16>
    %cst = arith.constant dense<0.000000e+00> : vector<128x128xf32>
    %5 = tpu.matmul %3, %4, %cst {dimension_numbers = #tpu.dot_dimension_numbers<[1], [0], [0], [1], [0, 0, 1, 1], [], []>} : vector<128x128xbf16>, vector<128x128xbf16>, vector<128x128xf32> -> vector<128x128xf32>
    %c0_4 = arith.constant 0 : index
    %c0_5 = arith.constant 0 : index
    %6 = vector.load %arg7[%c0_4, %c0_5] : memref<128x128xf32, #tpu.memory_space<vmem>>, vector<128x128xf32>
    %c0_6 = arith.constant 0 : index
    %c0_7 = arith.constant 0 : index
    %7 = vector.load %arg2[%c0_6, %c0_7] : memref<128x128xbf16, #tpu.memory_space<vmem>>, vector<128x128xbf16>
    %8 = arith.truncf %5 : vector<128x128xf32> to vector<128x128xbf16>
    %cst_8 = arith.constant dense<0.000000e+00> : vector<128x128xf32>
    %9 = tpu.matmul %7, %8, %cst_8 {dimension_numbers = #tpu.dot_dimension_numbers<[1], [0], [0], [1], [0, 0, 1, 1], [], []>} : vector<128x128xbf16>, vector<128x128xbf16>, vector<128x128xf32> -> vector<128x128xf32>
    %10 = arith.addf %6, %9 : vector<128x128xf32>
    %c0_9 = arith.constant 0 : index
    %c0_10 = arith.constant 0 : index
    %11 = vector.load %arg7[%c0_9, %c0_10] : memref<128x128xf32, #tpu.memory_space<vmem>>, vector<128x128xf32>
    tpu.vector_store %arg7[%c0_9, %c0_10], %10 {strides = array<i32>} : memref<128x128xf32, #tpu.memory_space<vmem>>, vector<128x128xf32>,
    %c0_i32_11 = arith.constant 0 : i32
    %12 = arith.cmpi eq, %arg1, %c0_i32_11 : i32
    %13 = arith.extui %12 : i1 to i32
    %c0_i32_12 = arith.constant 0 : i32
    %14 = arith.cmpi ne, %13, %c0_i32_12 : i32
    scf.if %14 {
      %c0_13 = arith.constant 0 : index
      %c0_14 = arith.constant 0 : index
      %15 = vector.load %arg7[%c0_13, %c0_14] : memref<128x128xf32, #tpu.memory_space<vmem>>, vector<128x128xf32>
      %c0_15 = arith.constant 0 : index
      %c0_16 = arith.constant 0 : index
      %16 = vector.load %arg5[%c0_15, %c0_16] : memref<1x128xf32, #tpu.memory_space<vmem>>, vector<1x128xf32>
      %17 = vector.broadcast %16 : vector<1x128xf32> to vector<128x128xf32>
      %18 = arith.addf %15, %17 : vector<128x128xf32>
      %cst_17 = arith.constant 0.000000e+00 : f32
      %19 = vector.broadcast %cst_17 : f32 to vector<128x128xf32>
      %20 = arith.maximumf %18, %19 : vector<128x128xf32>
      %21 = arith.truncf %20 : vector<128x128xf32> to vector<128x128xbf16>
      %c0_18 = arith.constant 0 : index
      %c0_19 = arith.constant 0 : index
      %22 = vector.load %arg6[%c0_18, %c0_19] : memref<128x128xbf16, #tpu.memory_space<vmem>>, vector<128x128xbf16>
      tpu.vector_store %arg6[%c0_18, %c0_19], %21 {strides = array<i32>} : memref<128x128xbf16, #tpu.memory_space<vmem>>, vector<128x128xbf16>,
    } else {
    }
    return
  }
  func.func @transform_0(%arg0: i32, %arg1: i32) -> (i32, i32) {
    %c0_i32 = arith.constant 0 : i32
    return %arg0, %arg1 : i32, i32
  }
  func.func @transform_1(%arg0: i32, %arg1: i32) -> (i32, i32) {
    %c0_i32 = arith.constant 0 : i32
    %c0_i32_0 = arith.constant 0 : i32
    return %arg1, %c0_i32 : i32, i32
  }
  func.func @transform_2(%arg0: i32, %arg1: i32) -> (i32, i32) {
    %c0_i32 = arith.constant 0 : i32
    %c0_i32_0 = arith.constant 0 : i32
    %c0_i32_1 = arith.constant 0 : i32
    return %c0_i32, %c0_i32_0 : i32, i32
  }
  func.func @transform_3(%arg0: i32, %arg1: i32) -> (i32, i32) {
    %c0_i32 = arith.constant 0 : i32
    %c0_i32_0 = arith.constant 0 : i32
    %c0_i32_1 = arith.constant 0 : i32
    return %c0_i32, %c0_i32_0 : i32, i32
  }
  func.func @transform_4(%arg0: i32, %arg1: i32) -> (i32, i32) {
    %c0_i32 = arith.constant 0 : i32
    %c0_i32_0 = arith.constant 0 : i32
    return %arg0, %c0_i32 : i32, i32
  }
}

</mosaic_0001>

<bundles_post_ra>
// kernel: tpu_custom_call.1
= control target key start
LH: loop header
LB: loop body
LE: loop exit
PB: predicated region body
PF: predicated region fallthrough
CT: control target
= control target key end

     0   :  { %9 = vsyncpa [#allocation4], 0  ;;  %s888_s0 = inlined_call_operand.hbm [shape: bf16[128,128], index: 0, kind: input, shape index: {}]   ;;  %s889_s1 = inlined_call_operand.hbm [shape: bf16[128,128], index: 1, kind: input, shape index: {}]   ;;  %s890_s2 = inlined_call_operand.hbm [shape: bf16[128,128], index: 2, kind: input, shape index: {}]   ;;  %s891_s3 = inlined_call_operand.vmem [shape: f32[1,128], index: 3, kind: input, shape index: {}]   ;;  %s892_s4 = inlined_call_operand.hbm [shape: bf16[128,128], index: 4, kind: output, shape index: {}]  }
   0x1   :  { %10 = vsyncpa [#allocation7], 0 }
   0x2   :  { %11 = vsyncpa [#allocation5], 0  ;;  %s29_s17 = sshll.u32 %s889_s1, 4  ;;  %s830_s18 = smov [#allocation6]   ;;  %s30_s17 = int_to_ptr.hbm [resolvable:$true] %s29_s17 }
   0x3   :  { %s31_s19 = sshll.u32 %s830_s18, 4  ;;  %s16_s22 = sshll.u32 %s888_s0, 4  ;;  %s32_s19 = int_to_ptr.vmem [resolvable:$true] %s31_s19  ;;  %s17_s22 = int_to_ptr.hbm [resolvable:$true] %s16_s22 }
   0x4   :  { %s831_s23 = smov 64   ;;  %s832_s24 = smov 4  }
   0x5   :  { %37 = dma.hbm_to_vmem [thread:$0]  %s30_s17, 1024, %s32_s19, [#allocation7], %s831_s23, %s831_s23, %s832_s24  }
   0x6   :  { %s833_s25 = smov [#allocation3]   ;;  %s42_s1 = sshll.u32 %s890_s2, 4  ;;  %s43_s1 = int_to_ptr.hbm [resolvable:$true] %s42_s1 }
   0x7   :  { %s18_s26 = sshll.u32 %s833_s25, 4  ;;  %s834_s0 = smov [#allocation8]   ;;  %s19_s26 = int_to_ptr.vmem [resolvable:$true] %s18_s26 }
   0x8   :  { %24 = dma.hbm_to_vmem [thread:$0]  %s17_s22, 1024, %s19_s26, [#allocation4], %s831_s23, %s831_s23, %s832_s24  }
   0x9   :  { %s44_s29 = sshll.u32 %s834_s0, 4  ;;  %s45_s29 = int_to_ptr.vmem [resolvable:$true] %s44_s29 }
   0xa   :  { %50 = dma.hbm_to_vmem [thread:$0]  %s43_s1, 1024, %s45_s29, [#allocation7], %s831_s23, %s831_s23, %s832_s24  }
   0xb   :  { %824 = dma.done.wait [#allocation4], 1024  }
   0xc   :  { %825 = vsyncadd [#allocation4], 4294966272 }
   0xd   :  { %826 = dma.done.wait [#allocation7], 2048  }
   0xe   :  { %827 = vsyncadd [#allocation7], 4294965248  ;;  %v649_v0 = vld [vmem:[#allocation8 + $0x38] sm:$0xff]  ;;  %v648_v1 = vld [vmem:[#allocation8 + $0x30] sm:$0xff]  ;;  %s524_s8 = sshll.u32 %s892_s4, 4  ;;  %s525_s8 = int_to_ptr.hbm [resolvable:$true] %s524_s8 }
   0xf   :  { %705 = vmatpush.bf16.msra.mxu2 %v649_v0  ;;  %213 = vmatpush.bf16.msra.mxu0 %v649_v0  ;;  %v647_v2 = vld [vmem:[#allocation8 + $0x28] sm:$0xff]  ;;  %v646_v3 = vld [vmem:[#allocation8 + $0x20] sm:$0xff]  ;;  %v645_v4 = vld [vmem:[#allocation8 + $0x18] sm:$0xff] }
  0x10   :  { %v644_v5 = vld [vmem:[#allocation8 + $0x10] sm:$0xff]  ;;  %v643_v6 = vld [vmem:[#allocation8 + $0x8] sm:$0xff]  ;;  %v642_v7 = vld [vmem:[#allocation8] sm:$0xff] }
  0x11   :  { %v638_v8 = vld [vmem:[#allocation6 + $0x20] sm:$0xff]  ;;  %v639_v10 = vld [vmem:[#allocation6 + $0x28] sm:$0xff]  ;;  %v640_v12 = vld [vmem:[#allocation6 + $0x30] sm:$0xff] }
  0x12   :  { %v634_v9 = vld [vmem:[#allocation6] sm:$0xff]  ;;  %v635_v11 = vld [vmem:[#allocation6 + $0x8] sm:$0xff]  ;;  %v636_v13 = vld [vmem:[#allocation6 + $0x10] sm:$0xff] }
  0x13   :  { %706 = vmatpush.bf16.msra.mxu2 %v648_v1  ;;  %214 = vmatpush.bf16.msra.mxu0 %v648_v1  ;;  %v641_v14 = vld [vmem:[#allocation6 + $0x38] sm:$0xff]  ;;  %v650_v40 = vld [vmem:[#allocation3] sm:$0xff]  ;;  %v651_v42 = vld [vmem:[#allocation3 + $0x8] sm:$0xff] }
  0x14   :  { %v637_v15 = vld [vmem:[#allocation6 + $0x18] sm:$0xff]  ;;  %v654_v41 = vld [vmem:[#allocation3 + $0x20] sm:$0xff]  ;;  %v655_v43 = vld [vmem:[#allocation3 + $0x28] sm:$0xff] }
  0x15   :  { %v652_v44 = vld [vmem:[#allocation3 + $0x10] sm:$0xff]  ;;  %v653_v46 = vld [vmem:[#allocation3 + $0x18] sm:$0xff]  ;;  %v727_v49 = vld [vmem:[%s891_s3] ss:$0 sm:$0xff]  ;;  %s835_s3 = smov [#allocation9]  }
  0x16   :  { %v656_v45 = vld [vmem:[#allocation3 + $0x30] sm:$0xff]  ;;  %v657_v47 = vld [vmem:[#allocation3 + $0x38] sm:$0xff]  ;;  %s522_s5 = sshll.u32 %s835_s3, 4  ;;  %s523_s5 = int_to_ptr.vmem [resolvable:$true] %s522_s5 }
  0x17   :  { %707 = vmatpush.bf16.msra.mxu2 %v647_v2  ;;  %215 = vmatpush.bf16.msra.mxu0 %v647_v2 }
  0x1b   :  { %708 = vmatpush.bf16.msra.mxu2 %v646_v3  ;;  %216 = vmatpush.bf16.msra.mxu0 %v646_v3 }
  0x1f   :  { %709 = vmatpush.bf16.msra.mxu2 %v645_v4  ;;  %217 = vmatpush.bf16.msra.mxu0 %v645_v4 }
  0x23   :  { %710 = vmatpush.bf16.msra.mxu2 %v644_v5  ;;  %218 = vmatpush.bf16.msra.mxu0 %v644_v5 }
  0x27   :  { %711 = vmatpush.bf16.msra.mxu2 %v643_v6  ;;  %219 = vmatpush.bf16.msra.mxu0 %v643_v6 }
  0x2b   :  { %712 = vmatpush.bf16.msra.mxu2 %v642_v7  ;;  %220 = vmatpush.bf16.msra.mxu0 %v642_v7 }
  0x2e   :  { %241 = vmatmul.bf16.vlgmr.msra.gmra.mxu2 %v638_v8  ;;  %221 = vmatmul.bf16.vlgmr.msra.gmra.mxu0 %v634_v9 }
  0x3e   :  { %246 = vmatmul.bf16.gmra.mxu2 %v639_v10  ;;  %226 = vmatmul.bf16.gmra.mxu0 %v635_v11 }
  0x4e   :  { %251 = vmatmul.bf16.gmra.mxu2 %v640_v12  ;;  %231 = vmatmul.bf16.gmra.mxu0 %v636_v13 }
  0x5e   :  { %256 = vmatmul.bf16.gmra.mxu2 %v641_v14  ;;  %236 = vmatmul.bf16.gmra.mxu0 %v637_v15 }
  0xab   :  { %v222_v17 = vpop.f32.mrf.mxu0 }
  0xb1   :  { %v242_v16 = vpop.f32.mrf.mxu2 }
  0xb3   :  { %v224_v19 = vpop.f32.mrf.mxu0 }
  0xb4   :  { %v294_v39 = vpack.c.bf16 %v224_v19, %v222_v17 }
  0xb9   :  { %v244_v18 = vpop.f32.mrf.mxu2 }
  0xba   :  { %v298_v34 = vpack.c.bf16 %v244_v18, %v242_v16 }
  0xbb   :  { %v227_v21 = vpop.f32.mrf.mxu0 }
  0xc1   :  { %v247_v20 = vpop.f32.mrf.mxu2 }
  0xc3   :  { %v229_v23 = vpop.f32.mrf.mxu0 }
  0xc4   :  { %v295_v38 = vpack.c.bf16 %v229_v23, %v227_v21 }
  0xc9   :  { %v249_v22 = vpop.f32.mrf.mxu2 }
  0xca   :  { %v299_v33 = vpack.c.bf16 %v249_v22, %v247_v20 }
  0xcb   :  { %v232_v25 = vpop.f32.mrf.mxu0 }
  0xd1   :  { %v252_v24 = vpop.f32.mrf.mxu2 }
  0xd3   :  { %v234_v28 = vpop.f32.mrf.mxu0 }
  0xd4   :  { %v296_v37 = vpack.c.bf16 %v234_v28, %v232_v25 }
  0xd9   :  { %v254_v26 = vpop.f32.mrf.mxu2 }
  0xda   :  { %v300_v32 = vpack.c.bf16 %v254_v26, %v252_v24 }
  0xdb   :  { %v237_v31 = vpop.f32.mrf.mxu0 }
  0xe1   :  { %v257_v27 = vpop.f32.mrf.mxu2 }
  0xe3   :  { %v239_v35 = vpop.f32.mrf.mxu0 }
  0xe4   :  { %v297_v36 = vpack.c.bf16 %v239_v35, %v237_v31 }
  0xe9   :  { %v259_v29 = vpop.f32.mrf.mxu2 }
  0xea   :  { %v301_v30 = vpack.c.bf16 %v259_v29, %v257_v27 }
  0xec   :  { %350 = vmatpush.bf16.msra.mxu1 %v301_v30  ;;  %713 = vmatpush.bf16.msra.mxu3 %v301_v30 }
  0xf0   :  { %351 = vmatpush.bf16.msra.mxu1 %v300_v32  ;;  %714 = vmatpush.bf16.msra.mxu3 %v300_v32 }
  0xf4   :  { %352 = vmatpush.bf16.msra.mxu1 %v299_v33  ;;  %715 = vmatpush.bf16.msra.mxu3 %v299_v33 }
  0xf8   :  { %353 = vmatpush.bf16.msra.mxu1 %v298_v34  ;;  %716 = vmatpush.bf16.msra.mxu3 %v298_v34 }
  0xfc   :  { %354 = vmatpush.bf16.msra.mxu1 %v297_v36  ;;  %717 = vmatpush.bf16.msra.mxu3 %v297_v36 }
 0x100   :  { %355 = vmatpush.bf16.msra.mxu1 %v296_v37  ;;  %718 = vmatpush.bf16.msra.mxu3 %v296_v37 }
 0x104   :  { %356 = vmatpush.bf16.msra.mxu1 %v295_v38  ;;  %719 = vmatpush.bf16.msra.mxu3 %v295_v38 }
 0x108   :  { %357 = vmatpush.bf16.msra.mxu1 %v294_v39  ;;  %720 = vmatpush.bf16.msra.mxu3 %v294_v39 }
 0x10b   :  { %358 = vmatmul.bf16.vlgmr.msra.gmra.mxu1 %v650_v40  ;;  %378 = vmatmul.bf16.vlgmr.msra.gmra.mxu3 %v654_v41 }
 0x11b   :  { %363 = vmatmul.bf16.gmra.mxu1 %v651_v42  ;;  %383 = vmatmul.bf16.gmra.mxu3 %v655_v43 }
 0x12b   :  { %368 = vmatmul.bf16.gmra.mxu1 %v652_v44  ;;  %388 = vmatmul.bf16.gmra.mxu3 %v656_v45 }
 0x13b   :  { %373 = vmatmul.bf16.gmra.mxu1 %v653_v46  ;;  %393 = vmatmul.bf16.gmra.mxu3 %v657_v47 }
 0x188   :  { %v359_v48 = vpop.f32.mrf.mxu1 }
 0x189   :  { %v454_v51 = vadd.f32 %v727_v49, %v359_v48 }
 0x18b   :  { %v470_v54 = vmax.f32 %v454_v51, 0.0 }
 0x18e   :  { %v379_v50 = vpop.f32.mrf.mxu3 }
 0x18f   :  { %v462_v56 = vadd.f32 %v727_v49, %v379_v50 }
 0x190   :  { %v361_v52 = vpop.f32.mrf.mxu1 }
 0x191   :  { %v455_v53 = vadd.f32 %v727_v49, %v361_v52  ;;  %v478_v61 = vmax.f32 %v462_v56, 0.0 }
 0x193   :  { %v471_v55 = vmax.f32 %v455_v53, 0.0 }
 0x195   :  { %v661_v57 = vpack.c.bf16 %v471_v55, %v470_v54 }
 0x196   :  { %v381_v58 = vpop.f32.mrf.mxu3 }
 0x197   :  { %662 = vst [vmem:[#allocation9] sm:$0xff] %v661_v57   ;;  %v463_v59 = vadd.f32 %v727_v49, %v381_v58 }
 0x198   :  { %v364_v60 = vpop.f32.mrf.mxu1 }
 0x199   :  { %v479_v62 = vmax.f32 %v463_v59, 0.0  ;;  %v456_v1 = vadd.f32 %v727_v49, %v364_v60 }
 0x19b   :  { %v681_v63 = vpack.c.bf16 %v479_v62, %v478_v61  ;;  %v472_v4 = vmax.f32 %v456_v1, 0.0 }
 0x19d   :  { %701 = vst [vmem:[#allocation9 + $0x20] sm:$0xff] %v681_v63  }
 0x19e   :  { %v384_v0 = vpop.f32.mrf.mxu3 }
 0x19f   :  { %v464_v6 = vadd.f32 %v727_v49, %v384_v0 }
 0x1a0   :  { %v366_v2 = vpop.f32.mrf.mxu1 }
 0x1a1   :  { %v457_v3 = vadd.f32 %v727_v49, %v366_v2  ;;  %v480_v11 = vmax.f32 %v464_v6, 0.0 }
 0x1a3   :  { %v473_v5 = vmax.f32 %v457_v3, 0.0 }
 0x1a5   :  { %v666_v7 = vpack.c.bf16 %v473_v5, %v472_v4 }
 0x1a6   :  { %v386_v8 = vpop.f32.mrf.mxu3 }
 0x1a7   :  { %698 = vst [vmem:[#allocation9 + $0x8] sm:$0xff] %v666_v7   ;;  %v465_v9 = vadd.f32 %v727_v49, %v386_v8 }
 0x1a8   :  { %v369_v10 = vpop.f32.mrf.mxu1 }
 0x1a9   :  { %v481_v12 = vmax.f32 %v465_v9, 0.0  ;;  %v458_v15 = vadd.f32 %v727_v49, %v369_v10 }
 0x1ab   :  { %v686_v13 = vpack.c.bf16 %v481_v12, %v480_v11  ;;  %v474_v18 = vmax.f32 %v458_v15, 0.0 }
 0x1ad   :  { %702 = vst [vmem:[#allocation9 + $0x28] sm:$0xff] %v686_v13  }
 0x1ae   :  { %v389_v14 = vpop.f32.mrf.mxu3 }
 0x1af   :  { %v466_v20 = vadd.f32 %v727_v49, %v389_v14 }
 0x1b0   :  { %v371_v16 = vpop.f32.mrf.mxu1 }
 0x1b1   :  { %v459_v17 = vadd.f32 %v727_v49, %v371_v16  ;;  %v482_v25 = vmax.f32 %v466_v20, 0.0 }
 0x1b3   :  { %v475_v19 = vmax.f32 %v459_v17, 0.0 }
 0x1b5   :  { %v671_v21 = vpack.c.bf16 %v475_v19, %v474_v18 }
 0x1b6   :  { %v391_v22 = vpop.f32.mrf.mxu3 }
 0x1b7   :  { %699 = vst [vmem:[#allocation9 + $0x10] sm:$0xff] %v671_v21   ;;  %v467_v23 = vadd.f32 %v727_v49, %v391_v22 }
 0x1b8   :  { %v374_v24 = vpop.f32.mrf.mxu1 }
 0x1b9   :  { %v483_v26 = vmax.f32 %v467_v23, 0.0  ;;  %v460_v29 = vadd.f32 %v727_v49, %v374_v24 }
 0x1bb   :  { %v691_v27 = vpack.c.bf16 %v483_v26, %v482_v25  ;;  %v476_v32 = vmax.f32 %v460_v29, 0.0 }
 0x1bd   :  { %703 = vst [vmem:[#allocation9 + $0x30] sm:$0xff] %v691_v27  }
 0x1be   :  { %v394_v28 = vpop.f32.mrf.mxu3 }
 0x1bf   :  { %v468_v34 = vadd.f32 %v727_v49, %v394_v28 }
 0x1c0   :  { %v376_v30 = vpop.f32.mrf.mxu1 }
 0x1c1   :  { %v461_v31 = vadd.f32 %v727_v49, %v376_v30  ;;  %v484_v38 = vmax.f32 %v468_v34, 0.0 }
 0x1c3   :  { %v477_v33 = vmax.f32 %v461_v31, 0.0 }
 0x1c5   :  { %v676_v35 = vpack.c.bf16 %v477_v33, %v476_v32 }
 0x1c6   :  { %v396_v36 = vpop.f32.mrf.mxu3 }
 0x1c7   :  { %700 = vst [vmem:[#allocation9 + $0x18] sm:$0xff] %v676_v35   ;;  %v469_v37 = vadd.f32 %v727_v49, %v396_v36 }
 0x1c9   :  { %v485_v39 = vmax.f32 %v469_v37, 0.0 }
 0x1cb   :  { %v696_v40 = vpack.c.bf16 %v485_v39, %v484_v38 }
 0x1cd   :  { %704 = vst [vmem:[#allocation9 + $0x38] sm:$0xff] %v696_v40  }
 0x1ce   :  { %530 = dma.vmem_to_hbm [thread:$0]  %s523_s5, 1024, %s525_s8, [#allocation5], %s831_s23, %s831_s23, %s832_s24  }
 0x1cf   :  { %828 = dma.done.wait [#allocation5], 1024  }
 0x1d0   :  { %829 = vsyncadd [#allocation5], 4294966272 }
 0x1d1   :  { %535 = vsyncpa [#allocation4], 1 }
 0x1d2   :  { %536 = vsyncpa [#allocation7], 1 }
 0x1d3   :  { %537 = vsyncpa [#allocation5], 1 }

</bundles_post_ra>
